<compile_context>
chip_gen: v7x
topology: tpu7x:2x2x1
jax: 0.10.0
libtpu: 0.0.40
codegen_flags: <defaults>
</compile_context>

<pallas_src>
import functools
import math

import jax
import jax.numpy as jnp
from jax.experimental import pallas as pl
from jax.experimental.pallas import tpu as pltpu


_TARGET_CHUNK_BYTES = 8 * 1024 * 1024   # ~8 MiB per DMA descriptor
_MAX_CHUNKS = 8                         # cap on concurrent DMA descriptors
_SMALL_BYTES = 1 * 1024 * 1024          # below this: plain jnp.reshape


def _cdiv(a, b):
    return -(-a // b)


def _make_dma_copy_kernel(starts_sizes):
    """Build a kernel issuing one HBM->HBM DMA per (start, rows) chunk of axis 0."""

    def kernel(x_hbm, o_hbm, sems):
        copies = []
        # Issue all descriptors first (concurrent DMAs), then wait on all.
        for c, (start, rows) in enumerate(starts_sizes):
            cp = pltpu.make_async_copy(
                x_hbm.at[pl.ds(start, rows)],
                o_hbm.at[pl.ds(start, rows)],
                sems.at[c],
            )
            cp.start()
            copies.append(cp)
        for cp in copies:
            cp.wait()

    return kernel


def _plan_chunks(dim0, total_bytes):
    """Split axis 0 into <= _MAX_CHUNKS chunks of ~_TARGET_CHUNK_BYTES each."""
    want = max(1, _cdiv(total_bytes, _TARGET_CHUNK_BYTES))
    n = max(1, min(dim0, _MAX_CHUNKS, want))
    rows = _cdiv(dim0, n)
    starts_sizes = []
    start = 0
    while start < dim0:
        sz = min(rows, dim0 - start)
        starts_sizes.append((start, sz))
        start += sz
    return tuple(starts_sizes)


@functools.partial(jax.jit, static_argnames=("size",))
def _unflatten_pallas(x, size):
    # Present the data already in the requested view shape (metadata-only for
    # contiguous data); the kernel then performs the single HBM->HBM copy.
    xv = jnp.reshape(x, size)
    dim0 = size[0]
    total_bytes = math.prod(size) * jnp.dtype(x.dtype).itemsize
    starts_sizes = _plan_chunks(dim0, total_bytes)

    return pl.pallas_call(
        _make_dma_copy_kernel(starts_sizes),
        out_shape=jax.ShapeDtypeStruct(size, x.dtype),
        in_specs=[pl.BlockSpec(memory_space=pl.ANY)],
        out_specs=pl.BlockSpec(memory_space=pl.ANY),
        scratch_shapes=[pltpu.SemaphoreType.DMA((len(starts_sizes),))],
    )(xv)


def unflatten(x, size, use_pallas=True, min_pallas_bytes=_SMALL_BYTES):
    """Pallas-backed equivalent of `x.view(*size)` (contiguous reshape).

    use_pallas=False (or a tensor below `min_pallas_bytes`, or empty/scalar
    outputs) takes the production path: a view is metadata-only, so plain
    jnp.reshape is strictly better than any copy kernel.
    """
    size = tuple(int(d) for d in size)
    total = math.prod(x.shape)
    if -1 in size:
        known = math.prod(d for d in size if d != -1)
        if known == 0:
            assert total == 0, f"cannot view array of {total} elements as {size}"
            size = tuple(0 if d == -1 else d for d in size)
        else:
            size = tuple(total // known if d == -1 else d for d in size)
    assert total == math.prod(size), (
        f"cannot view array of {total} elements as {size}"
    )

    itemsize = jnp.dtype(x.dtype).itemsize
    if (not use_pallas or total == 0 or len(size) == 0
            or total * itemsize < min_pallas_bytes):
        return jnp.reshape(x, size)
    return _unflatten_pallas(x, size)


if __name__ == "__main__":
    key = jax.random.PRNGKey(0)

    # Flattened activations: batch=2, channels=4, spatial=16x16 -> flat (2, 1024)
    size = (2, 4, 16, 16)
    x = jax.random.normal(key, (2, 4 * 16 * 16), dtype=jnp.float32)

    # Force the Pallas DMA-copy kernel even though this demo tensor is small
    # enough that production code would take the reshape fast path.
    y = unflatten(x, size, use_pallas=True, min_pallas_bytes=0)
    jax.block_until_ready(y)

    ref = jnp.reshape(x, size)
    assert y.shape == size
    assert y.dtype == x.dtype
    assert bool(jnp.all(y == ref))

    # Default (production) path: small tensor -> metadata-only reshape.
    y_fast = unflatten(x, size)
    assert bool(jnp.all(y_fast == ref))

    print("KERNEL_OK")
</pallas_src>

<mosaic_0001>
module attributes {stable_mosaic.version = 11 : i64} {
  func.func @kernel(%arg0: memref<2x4x16x16xf32, #tpu.memory_space<any>>, %arg1: memref<2x4x16x16xf32, #tpu.memory_space<any>>, %arg2: memref<1x!tpu.dma_semaphore, #tpu.memory_space<semaphore_mem>>) attributes {dimension_semantics = [], scalar_prefetch = 0 : i64, scratch_operands = 1 : i64, tpu.core_type = #tpu.core_type<tc>} {
    %c0_i32 = arith.constant 0 : i32
    %c0_i32_0 = arith.constant 0 : i32
    %c0_i32_1 = arith.constant 0 : i32
    %c0_i32_2 = arith.constant 0 : i32
    %c0_i32_3 = arith.constant 0 : i32
    %0 = tpu.memref_slice %arg0[%c0_i32_0, %c0_i32_1, %c0_i32_2, %c0_i32_3] : memref<2x4x16x16xf32, #tpu.memory_space<any>> -> memref<2x4x16x16xf32, #tpu.memory_space<any>>
    %c0_i32_4 = arith.constant 0 : i32
    %c0_i32_5 = arith.constant 0 : i32
    %c0_i32_6 = arith.constant 0 : i32
    %c0_i32_7 = arith.constant 0 : i32
    %1 = tpu.memref_slice %arg1[%c0_i32_4, %c0_i32_5, %c0_i32_6, %c0_i32_7] : memref<2x4x16x16xf32, #tpu.memory_space<any>> -> memref<2x4x16x16xf32, #tpu.memory_space<any>>
    %2 = tpu.memref_slice %arg2[%c0_i32] : memref<1x!tpu.dma_semaphore, #tpu.memory_space<semaphore_mem>> -> memref<1x!tpu.dma_semaphore, #tpu.memory_space<semaphore_mem>>
    %3 = tpu.memref_squeeze %2 : memref<1x!tpu.dma_semaphore, #tpu.memory_space<semaphore_mem>> -> memref<!tpu.dma_semaphore, #tpu.memory_space<semaphore_mem>>
    tpu.enqueue_dma source(%0 : memref<2x4x16x16xf32, #tpu.memory_space<any>>) target(%1 : memref<2x4x16x16xf32, #tpu.memory_space<any>>) target_semaphore(%3 : memref<!tpu.dma_semaphore, #tpu.memory_space<semaphore_mem>>)
    %c0_i32_8 = arith.constant 0 : i32
    %c0_i32_9 = arith.constant 0 : i32
    %c0_i32_10 = arith.constant 0 : i32
    %c0_i32_11 = arith.constant 0 : i32
    %c0_i32_12 = arith.constant 0 : i32
    %4 = tpu.memref_slice %arg0[%c0_i32_9, %c0_i32_10, %c0_i32_11, %c0_i32_12] : memref<2x4x16x16xf32, #tpu.memory_space<any>> -> memref<2x4x16x16xf32, #tpu.memory_space<any>>
    %c0_i32_13 = arith.constant 0 : i32
    %c0_i32_14 = arith.constant 0 : i32
    %c0_i32_15 = arith.constant 0 : i32
    %c0_i32_16 = arith.constant 0 : i32
    %5 = tpu.memref_slice %arg1[%c0_i32_13, %c0_i32_14, %c0_i32_15, %c0_i32_16] : memref<2x4x16x16xf32, #tpu.memory_space<any>> -> memref<2x4x16x16xf32, #tpu.memory_space<any>>
    %6 = tpu.memref_slice %arg2[%c0_i32_8] : memref<1x!tpu.dma_semaphore, #tpu.memory_space<semaphore_mem>> -> memref<1x!tpu.dma_semaphore, #tpu.memory_space<semaphore_mem>>
    %7 = tpu.memref_squeeze %6 : memref<1x!tpu.dma_semaphore, #tpu.memory_space<semaphore_mem>> -> memref<!tpu.dma_semaphore, #tpu.memory_space<semaphore_mem>>
    tpu.wait_dma2 semaphore(%7 : memref<!tpu.dma_semaphore, #tpu.memory_space<semaphore_mem>>) src(%4 : memref<2x4x16x16xf32, #tpu.memory_space<any>>) dst(%5 : memref<2x4x16x16xf32, #tpu.memory_space<any>>)
    return
  }
}

</mosaic_0001>

<bundles_post_ra>
// kernel: _unflatten_pallas.1
= control target key start
LH: loop header
LB: loop body
LE: loop exit
PB: predicated region body
PF: predicated region fallthrough
CT: control target
= control target key end

     0   :  { %s78_s0 = inlined_call_operand.vmem [shape: f32[2,4,16,16], index: 0, kind: input, shape index: {}]   ;;  %s79_s1 = inlined_call_operand.hbm [shape: f32[2,4,16,16], index: 1, kind: output, shape index: {}]  }
   0x1   :  { %s13_s8 = sshll.u32 %s78_s0, 4  ;;  %s14_s8 = int_to_ptr.vmem [resolvable:$true] %s13_s8 }
   0x2   :  { %s29_s9 = scalar_lea.vmem %s14_s8, 2048  ;;  %p34_p1 = scmp.lt.s32.totalorder %s14_s8, %s14_s8 }
   0x3   :  { %p30_p0 = scmp.ne.s32.totalorder %s14_s8, %s29_s9  ;;  %p35_p2 = scmp.lt.s32.totalorder %s29_s9, %s29_s9 }
   0x5   :  { %p36_p3 = por %p35_p2, %p34_p1 }
   0x7   :  { %p37_p4 = pnand %p36_p3, %p30_p0 }
   0x9   :  { %40 = shalt.err (!%p37_p4)  }
   0xa   :  { %s41_s12 = scalar_lea.hbm %s79_s1, 2048 }
   0xb   :  { %p42_p5 = scmp.ne.s32.totalorder %s79_s1, %s41_s12  ;;  %p45_p6 = scmp.lt.u32.totalorder %s41_s12, %s79_s1 }
   0xd   :  { %p47_p7 = pnand %p45_p6, %p42_p5 }
   0xf   :  { %50 = shalt.err (!%p47_p7)  }
  0x10   :  { %16 = dma.vmem_to_hbm [thread:$0]  %s14_s8, 2048, %s79_s1, [#allocation2] }
  0x11   :  { %51 = dma.done.wait [#allocation2], 2048 }
  0x12   :  { %52 = vsyncadd [#allocation2], 4294965248 }
  0x13   :  { %22 = vsyncmov [#allocation2] }
  0x16   :  { %s23_s18 = vpop.sfrf %22 }
  0x17   :  { %p28_p8 = scmp.ne.s32.totalorder %s23_s18, 0 }
  0x19   :  { %27 = shalt.err (%p28_p8)  }

</bundles_post_ra>
